<compile_context>
chip_gen: v7x
topology: tpu7x:2x2x1
jax: 0.10.0
libtpu: 0.0.40
codegen_flags: <defaults>
</compile_context>

<pallas_src>
import jax
import jax.numpy as jnp
from jax.experimental import pallas as pl
from jax.experimental.pallas import tpu as pltpu

EPS = 1e-5
LANE = 128
ALIGN_M = 16  # sublane alignment safe for both f32 and bf16 outputs


def _round_up(x, m):
    return ((x + m - 1) // m) * m


def _matmul_stats_kernel(p_ref, w_ref, y_ref, sum_ref, ssq_ref):
    """One (M-tile, Cout-tile) grid step: conv-as-matmul + streamed BN statistics.

    p_ref:   (tile_m, K)        im2col patches (compute dtype)
    w_ref:   (K, tile_cout)     im2col-reshaped weight (compute dtype)
    y_ref:   (tile_m, tile_cout) conv output (f32 or bf16), lane-dense
    sum_ref: (1, 1, tile_cout)   per-(tile, channel) sum (f32)
    ssq_ref: (1, 1, tile_cout)   per-(tile, channel) sum of squares (f32)
    """
    acc = jnp.dot(p_ref[...], w_ref[...], preferred_element_type=jnp.float32)
    y_ref[...] = acc.astype(y_ref.dtype)
    # BN partial statistics taken from the f32 accumulator while it is in VMEM.
    s = jnp.sum(acc, axis=0, keepdims=True)          # (1, tile_cout)
    q = jnp.sum(acc * acc, axis=0, keepdims=True)    # (1, tile_cout)
    sum_ref[...] = s.reshape(sum_ref.shape)
    ssq_ref[...] = q.reshape(ssq_ref.shape)


def basic_conv2d(x_nchw, w_oihw, gamma, beta, *, stride=1, padding=1, dilation=1,
                 compute_dtype=jnp.float32, tile_m=1024, tile_cout=LANE):
    """BasicConv2d.forward: Conv2d(bias=False) + BatchNorm2d (training-mode batch
    statistics, biased variance, eps=1e-5). No ReLU (forward() does not call it)."""
    N, Cin, H, W = x_nchw.shape
    Cout, Cin_w, KH, KW = w_oihw.shape
    assert Cin_w == Cin
    assert gamma.shape == (Cout,) and beta.shape == (Cout,)

    compute_dtype = jnp.dtype(compute_dtype)
    Hout = (H + 2 * padding - dilation * (KH - 1) - 1) // stride + 1
    Wout = (W + 2 * padding - dilation * (KW - 1) - 1) // stride + 1
    K = KH * KW * Cin
    M_total = N * Hout * Wout

    # ---- XLA glue: im2col (small-Cin path) + weight reshape --------------------
    # TODO(synk): for large Cin (>= ~64) fold the im2col inside the kernel
    # (overlapping row blocks / in-kernel halo DMA) to avoid the KH*KW x HBM
    # expansion of the activations done here.
    x_nhwc = jnp.transpose(x_nchw, (0, 2, 3, 1)).astype(jnp.float32)
    x_pad = jnp.pad(x_nhwc, ((0, 0), (padding, padding), (padding, padding), (0, 0)))
    taps = []
    for kh in range(KH):          # static 3x3 unroll; ordering matches weight reshape
        for kw in range(KW):
            h0, w0 = kh * dilation, kw * dilation
            taps.append(x_pad[:, h0:h0 + (Hout - 1) * stride + 1:stride,
                                 w0:w0 + (Wout - 1) * stride + 1:stride, :])
    patches = jnp.concatenate(taps, axis=-1).reshape(M_total, K)

    Cout_p = _round_up(Cout, LANE)
    tile_cout = max(LANE, min(_round_up(tile_cout, LANE), Cout_p))
    w_mat = jnp.transpose(w_oihw, (2, 3, 1, 0)).reshape(K, Cout)
    w_mat = jnp.pad(w_mat, ((0, 0), (0, Cout_p - Cout))).astype(compute_dtype)

    # bf16 intermediate y when computing in bf16 (halves the largest HBM terms).
    y_dtype = jnp.float32 if compute_dtype == jnp.dtype(jnp.float32) else compute_dtype
    cbytes = compute_dtype.itemsize
    ybytes = jnp.dtype(y_dtype).itemsize

    # ---- spatial (M) tiling: bound VMEM and create pipeline depth --------------
    tile_m = max(ALIGN_M, (tile_m // ALIGN_M) * ALIGN_M)
    tile_m = min(tile_m, _round_up(M_total, ALIGN_M))

    def step_bytes(tm):  # double-buffered working set for one grid step
        return 2 * (tm * K * cbytes + K * tile_cout * cbytes
                    + tm * tile_cout * ybytes + 2 * tile_cout * 4)

    while tile_m > ALIGN_M and step_bytes(tile_m) > (24 << 20):
        tile_m = max(ALIGN_M, (tile_m // 2 // ALIGN_M) * ALIGN_M)

    M_pad = _round_up(M_total, tile_m)
    # Zero padding rows contribute 0 to both sum and sum-of-squares; the BN
    # finalize divides by the true count, so padded rows never affect the stats.
    patches = jnp.pad(patches, ((0, M_pad - M_total), (0, 0))).astype(compute_dtype)

    num_m = M_pad // tile_m
    num_j = Cout_p // tile_cout
    grid = (num_m, num_j)

    vmem_limit = int(min(max(4 * step_bytes(tile_m), 8 << 20), 48 << 20))
    cparams = pltpu.CompilerParams(
        dimension_semantics=("parallel", "parallel"),
        vmem_limit_bytes=vmem_limit)
    cost = pl.CostEstimate(
        flops=2 * M_pad * K * Cout_p,
        transcendentals=0,
        bytes_accessed=(M_pad * K * cbytes + K * Cout_p * cbytes
                        + M_pad * Cout_p * ybytes + 2 * num_m * Cout_p * 4))

    # ---- pass 1 (only Pallas pass): conv matmul + streamed channel stats -------
    y, psum, pssq = pl.pallas_call(
        _matmul_stats_kernel,
        out_shape=(
            jax.ShapeDtypeStruct((M_pad, Cout_p), y_dtype),
            jax.ShapeDtypeStruct((num_m, 1, Cout_p), jnp.float32),
            jax.ShapeDtypeStruct((num_m, 1, Cout_p), jnp.float32),
        ),
        grid=grid,
        in_specs=[
            pl.BlockSpec((tile_m, K), lambda m, j: (m, 0)),
            pl.BlockSpec((K, tile_cout), lambda m, j: (0, j)),
        ],
        out_specs=(
            pl.BlockSpec((tile_m, tile_cout), lambda m, j: (m, j)),
            pl.BlockSpec((1, 1, tile_cout), lambda m, j: (m, 0, j)),
            pl.BlockSpec((1, 1, tile_cout), lambda m, j: (m, 0, j)),
        ),
        compiler_params=cparams,
        cost_estimate=cost,
    )(patches, w_mat)

    # ---- BN finalize + affine in XLA glue, fused with un-pad + transpose -------
    # TODO(synk): one-pass E[x^2]-E[x]^2 in f32 can lose precision for channels
    # with |mean| >> std at very large N*H*W; switch to a two-pass reduce there.
    count = jnp.float32(M_total)
    tot_sum = jnp.sum(psum, axis=(0, 1))[:Cout]
    tot_ssq = jnp.sum(pssq, axis=(0, 1))[:Cout]
    mean = tot_sum / count
    var = jnp.maximum(tot_ssq / count - mean * mean, 0.0)   # biased (training BN)
    inv = jax.lax.rsqrt(var + EPS)
    scale = gamma.astype(jnp.float32) * inv
    shift = beta.astype(jnp.float32) - mean * scale

    y_val = y[:M_total, :Cout].astype(jnp.float32)
    out = y_val * scale[None, :] + shift[None, :]
    out = out.reshape(N, Hout, Wout, Cout)
    return jnp.transpose(out, (0, 3, 1, 2))


def reference_forward(x_nchw, w_oihw, gamma, beta, *, stride=1, padding=1, dilation=1):
    """Pure-JAX reference (f32 conv + training-mode BN) for validation."""
    y = jax.lax.conv_general_dilated(
        x_nchw, w_oihw, window_strides=(stride, stride),
        padding=((padding, padding), (padding, padding)),
        rhs_dilation=(dilation, dilation),
        dimension_numbers=("NCHW", "OIHW", "NCHW"))
    mean = y.mean(axis=(0, 2, 3), keepdims=True)
    var = y.var(axis=(0, 2, 3), keepdims=True)  # biased, like BN training
    return (y - mean) / jnp.sqrt(var + EPS) * gamma.reshape(1, -1, 1, 1) \
        + beta.reshape(1, -1, 1, 1)


if __name__ == "__main__":
    # BasicConv2d(in_planes=4, out_planes=8, kernel_size=3, stride=1, padding=1)
    N, Cin, H, W = 2, 4, 16, 16
    Cout, KH, KW = 8, 3, 3

    key = jax.random.PRNGKey(0)
    kx, kw_, kg, kb = jax.random.split(key, 4)
    x = jax.random.normal(kx, (N, Cin, H, W), dtype=jnp.float32)
    w = jax.random.normal(kw_, (Cout, Cin, KH, KW), dtype=jnp.float32) * 0.1
    gamma = 1.0 + 0.25 * jax.random.normal(kg, (Cout,), dtype=jnp.float32)
    beta = 0.1 * jax.random.normal(kb, (Cout,), dtype=jnp.float32)

    ref = reference_forward(x, w, gamma, beta, padding=1)

    # f32 MXU path (tight check).
    out = basic_conv2d(x, w, gamma, beta, padding=1, compute_dtype=jnp.float32)
    out = jax.block_until_ready(out)
    assert out.shape == (N, Cout, H, W), out.shape
    assert jnp.allclose(out, ref, atol=1e-3, rtol=1e-3), \
        float(jnp.max(jnp.abs(out - ref)))

    # bf16 MXU path (v6e/v7x throughput option; f32 accumulation, f32 BN stats,
    # bf16 intermediate y). Loose tolerance — bounded by bf16 quantization.
    out_bf16 = basic_conv2d(x, w, gamma, beta, padding=1,
                            compute_dtype=jnp.bfloat16)
    out_bf16 = jax.block_until_ready(out_bf16)
    assert jnp.allclose(out_bf16, ref, atol=1e-1, rtol=1e-1), \
        float(jnp.max(jnp.abs(out_bf16 - ref)))

    print("KERNEL_OK")
</pallas_src>

<mosaic_0001>
module attributes {stable_mosaic.version = 11 : i64} {
  func.func @_matmul_stats_kernel(%arg0: i32, %arg1: i32, %arg2: memref<512x36xf32, #tpu.memory_space<vmem>>, %arg3: memref<36x128xf32, #tpu.memory_space<vmem>>, %arg4: memref<512x128xf32, #tpu.memory_space<vmem>>, %arg5: memref<1x1x128xf32, #tpu.memory_space<vmem>>, %arg6: memref<1x1x128xf32, #tpu.memory_space<vmem>>) attributes {dimension_semantics = [#tpu.dimension_semantics<parallel>, #tpu.dimension_semantics<parallel>], iteration_bounds = array<i64: 1, 1>, scalar_prefetch = 0 : i64, scratch_operands = 0 : i64, tpu.core_type = #tpu.core_type<tc>, window_params = [{transform_indices = @transform_0, window_bounds = array<i64: 512, 36>}, {transform_indices = @transform_1, window_bounds = array<i64: 36, 128>}, {transform_indices = @transform_2, window_bounds = array<i64: 512, 128>}, {transform_indices = @transform_3, window_bounds = array<i64: 1, 1, 128>}, {transform_indices = @transform_4, window_bounds = array<i64: 1, 1, 128>}]} {
    %c0 = arith.constant 0 : index
    %c0_0 = arith.constant 0 : index
    %0 = vector.load %arg2[%c0, %c0_0] : memref<512x36xf32, #tpu.memory_space<vmem>>, vector<512x36xf32>
    %c0_1 = arith.constant 0 : index
    %c0_2 = arith.constant 0 : index
    %1 = vector.load %arg3[%c0_1, %c0_2] : memref<36x128xf32, #tpu.memory_space<vmem>>, vector<36x128xf32>
    %cst = arith.constant dense<0.000000e+00> : vector<512x128xf32>
    %2 = tpu.matmul %0, %1, %cst {dimension_numbers = #tpu.dot_dimension_numbers<[1], [0], [0], [1], [0, 0, 1, 1], [], []>} : vector<512x36xf32>, vector<36x128xf32>, vector<512x128xf32> -> vector<512x128xf32>
    %c0_3 = arith.constant 0 : index
    %c0_4 = arith.constant 0 : index
    %3 = vector.load %arg4[%c0_3, %c0_4] : memref<512x128xf32, #tpu.memory_space<vmem>>, vector<512x128xf32>
    tpu.vector_store %arg4[%c0_3, %c0_4], %2 {strides = array<i32>} : memref<512x128xf32, #tpu.memory_space<vmem>>, vector<512x128xf32>,
    %cst_5 = arith.constant dense<0.000000e+00> : vector<128xf32>
    %4 = vector.multi_reduction <add>, %2, %cst_5 [0] : vector<512x128xf32> to vector<128xf32>
    %5 = vector.shape_cast %4 : vector<128xf32> to vector<1x128xf32>
    %6 = arith.mulf %2, %2 : vector<512x128xf32>
    %cst_6 = arith.constant dense<0.000000e+00> : vector<128xf32>
    %7 = vector.multi_reduction <add>, %6, %cst_6 [0] : vector<512x128xf32> to vector<128xf32>
    %8 = vector.shape_cast %7 : vector<128xf32> to vector<1x128xf32>
    %9 = vector.shape_cast %5 : vector<1x128xf32> to vector<1x1x128xf32>
    %c0_7 = arith.constant 0 : index
    %c0_8 = arith.constant 0 : index
    %c0_9 = arith.constant 0 : index
    %10 = vector.load %arg5[%c0_7, %c0_8, %c0_9] : memref<1x1x128xf32, #tpu.memory_space<vmem>>, vector<1x1x128xf32>
    tpu.vector_store %arg5[%c0_7, %c0_8, %c0_9], %9 {strides = array<i32>} : memref<1x1x128xf32, #tpu.memory_space<vmem>>, vector<1x1x128xf32>,
    %11 = vector.shape_cast %8 : vector<1x128xf32> to vector<1x1x128xf32>
    %c0_10 = arith.constant 0 : index
    %c0_11 = arith.constant 0 : index
    %c0_12 = arith.constant 0 : index
    %12 = vector.load %arg6[%c0_10, %c0_11, %c0_12] : memref<1x1x128xf32, #tpu.memory_space<vmem>>, vector<1x1x128xf32>
    tpu.vector_store %arg6[%c0_10, %c0_11, %c0_12], %11 {strides = array<i32>} : memref<1x1x128xf32, #tpu.memory_space<vmem>>, vector<1x1x128xf32>,
    return
  }
  func.func @transform_0(%arg0: i32, %arg1: i32) -> (i32, i32) {
    %c0_i32 = arith.constant 0 : i32
    %c0_i32_0 = arith.constant 0 : i32
    return %arg0, %c0_i32 : i32, i32
  }
  func.func @transform_1(%arg0: i32, %arg1: i32) -> (i32, i32) {
    %c0_i32 = arith.constant 0 : i32
    %c0_i32_0 = arith.constant 0 : i32
    return %c0_i32, %arg1 : i32, i32
  }
  func.func @transform_2(%arg0: i32, %arg1: i32) -> (i32, i32) {
    %c0_i32 = arith.constant 0 : i32
    return %arg0, %arg1 : i32, i32
  }
  func.func @transform_3(%arg0: i32, %arg1: i32) -> (i32, i32, i32) {
    %c0_i32 = arith.constant 0 : i32
    %c0_i32_0 = arith.constant 0 : i32
    return %arg0, %c0_i32, %arg1 : i32, i32, i32
  }
  func.func @transform_4(%arg0: i32, %arg1: i32) -> (i32, i32, i32) {
    %c0_i32 = arith.constant 0 : i32
    %c0_i32_0 = arith.constant 0 : i32
    return %arg0, %c0_i32, %arg1 : i32, i32, i32
  }
}

</mosaic_0001>

<bundles_post_ra>
// kernel: tpu_custom_call.1
= control target key start
LH: loop header
LB: loop body
LE: loop exit
PB: predicated region body
PF: predicated region fallthrough
CT: control target
= control target key end

     0   :  { %10 = vsyncpa [#allocation3], 0  ;;  %vm85_vm0 = vcmask 293888   ;;  %vm278_vm1 = vcmask 1043456   ;;  %s1851_s0 = inlined_call_operand.vmem [shape: f32[512,36], index: 0, kind: input, shape index: {}]   ;;  %s1852_s1 = inlined_call_operand.vmem [shape: f32[36,128], index: 1, kind: input, shape index: {}]   ;;  %s1853_s2 = inlined_call_operand.hbm [shape: f32[512,128], index: 2, kind: output, shape index: {0}]   ;;  %s1854_s3 = inlined_call_operand.hbm [shape: f32[1,1,128], index: 3, kind: output, shape index: {1}]   ;;  %s1855_s4 = inlined_call_operand.hbm [shape: f32[1,1,128], index: 4, kind: output, shape index: {2}]  }
   0x1   :  { %v80_v0 = vld [vmem:[%s1852_s1] sm:$0xff]  ;;  %v81_v1 = vld [vmem:[%s1852_s1 + $0x8] sm:$0xff]  ;;  %v82_v2 = vld [vmem:[%s1852_s1 + $0x10] sm:$0xff] }
   0x2   :  { %v1218_v3 = vpack.c.bf16 %v81_v1, %v80_v0  ;;  %v83_v4 = vld [vmem:[%s1852_s1 + $0x18] sm:$0xff]  ;;  %v16_v5 = vld [vmem:[%s1851_s0] sm:$0xff]  ;;  %v17_v8 = vld [vmem:[%s1851_s0 + $0x8] sm:$0xff] }
   0x3   :  { %v1222_v6 = vpack.c.bf16 %v83_v4, %v82_v2  ;;  %1122 = vmatprep.mubr.msk.f32.mxu0 %vm85_vm0, %v16_v5  ;;  %v84_v7 = vld [vmem:[%s1852_s1 + $0x20] sm:$0xf]  ;;  %v18_v9 = vld [vmem:[%s1851_s0 + $0x10] sm:$0xff]  ;;  %v49_v11 = vld [vmem:[%s1851_s0 + $0x108] sm:$0xff] }
   0x4   :  { %1219 = vmatprep.subr.bf16.mxu0 %v1218_v3  ;;  %1226 = vmatprep.subr.bf16.mxu1 %v1218_v3  ;;  %v48_v10 = vld [vmem:[%s1851_s0 + $0x100] sm:$0xff]  ;;  %v50_v12 = vld [vmem:[%s1851_s0 + $0x110] sm:$0xff]  ;;  %v19_v13 = vld [vmem:[%s1851_s0 + $0x18] sm:$0xff] }
   0x5   :  { %1221 = vmatpush3.bf16.msra.mxu0 %v1218_v3  ;;  %1229 = vmatpush3.bf16.msra.mxu1 %v1218_v3  ;;  %v20_v14 = vld [vmem:[%s1851_s0 + $0x20] sm:$0xff]  ;;  %v51_v15 = vld [vmem:[%s1851_s0 + $0x118] sm:$0xff]  ;;  %v21_v17 = vld [vmem:[%s1851_s0 + $0x28] sm:$0xff] }
   0x6   :  { %1223 = vmatprep.subr.bf16.mxu0 %v1222_v6  ;;  %1227 = vmatprep.subr.bf16.mxu1 %v1222_v6  ;;  %v52_v16 = vld [vmem:[%s1851_s0 + $0x120] sm:$0xff]  ;;  %v22_v18 = vld [vmem:[%s1851_s0 + $0x30] sm:$0xff]  ;;  %v53_v19 = vld [vmem:[%s1851_s0 + $0x128] sm:$0xff] }
   0x7   :  { %1170 = vmatprep.mubr.msk.f32.mxu1 %vm85_vm0, %v48_v10  ;;  %v54_v20 = vld [vmem:[%s1851_s0 + $0x130] sm:$0xff]  ;;  %v23_v21 = vld [vmem:[%s1851_s0 + $0x38] sm:$0xff]  ;;  %v24_v22 = vld [vmem:[%s1851_s0 + $0x40] sm:$0xff] }
   0x8   :  { %v55_v23 = vld [vmem:[%s1851_s0 + $0x138] sm:$0xff] }
   0x9   :  { %1225 = vmatpush3.bf16.msra.mxu0 %v1222_v6  ;;  %1230 = vmatpush3.bf16.msra.mxu1 %v1222_v6 }
   0xa   :  { %1120 = vmatprep.subr.msk.mxu0 %vm278_vm1, %v84_v7  ;;  %1228 = vmatprep.subr.msk.mxu1 %vm278_vm1, %v84_v7 }
   0xd   :  { %1121 = vmatpush3.msk.msra.mxu0 %vm278_vm1, %v84_v7  ;;  %1231 = vmatpush3.msk.msra.mxu1 %vm278_vm1, %v84_v7 }
   0xe   :  { %1123 = vmatmul.mubr.msk.f32.vlgmr.msra.gmra.mrb[0].mxu0 %vm85_vm0, %v17_v8  ;;  %1171 = vmatmul.mubr.msk.f32.vlgmr.msra.gmra.mrb[0].mxu1 %vm85_vm0, %v49_v11 }
   0xf   :  { %1125 = vmatprep.mubr.msk.f32.mxu0 %vm85_vm0, %v18_v9  ;;  %1173 = vmatprep.mubr.msk.f32.mxu1 %vm85_vm0, %v50_v12 }
  0x12   :  { %1126 = vmatmul.mubr.msk.f32.gmra.mrb[2].mxu0 %vm85_vm0, %v19_v13  ;;  %1174 = vmatmul.mubr.msk.f32.gmra.mrb[2].mxu1 %vm85_vm0, %v51_v15 }
  0x13   :  { %1128 = vmatprep.mubr.msk.f32.mxu0 %vm85_vm0, %v20_v14  ;;  %1176 = vmatprep.mubr.msk.f32.mxu1 %vm85_vm0, %v52_v16 }
  0x16   :  { %1129 = vmatmul.mubr.msk.f32.gmra.mrb[4].mxu0 %vm85_vm0, %v21_v17  ;;  %1177 = vmatmul.mubr.msk.f32.gmra.mrb[4].mxu1 %vm85_vm0, %v53_v19 }
  0x17   :  { %1131 = vmatprep.mubr.msk.f32.mxu0 %vm85_vm0, %v22_v18  ;;  %1179 = vmatprep.mubr.msk.f32.mxu1 %vm85_vm0, %v54_v20 }
  0x18   :  { %11 = vsyncpa [#allocation5], 0  ;;  %v56_v24 = vld [vmem:[%s1851_s0 + $0x140] sm:$0xff]  ;;  %v25_v25 = vld [vmem:[%s1851_s0 + $0x48] sm:$0xff] }
  0x19   :  { %v26_v26 = vld [vmem:[%s1851_s0 + $0x50] sm:$0xff]  ;;  %v57_v27 = vld [vmem:[%s1851_s0 + $0x148] sm:$0xff]  ;;  %v27_v29 = vld [vmem:[%s1851_s0 + $0x58] sm:$0xff] }
  0x1a   :  { %1132 = vmatmul.mubr.msk.f32.gmra.mrb[6].mxu0 %vm85_vm0, %v23_v21  ;;  %1180 = vmatmul.mubr.msk.f32.gmra.mrb[6].mxu1 %vm85_vm0, %v55_v23  ;;  %v58_v28 = vld [vmem:[%s1851_s0 + $0x150] sm:$0xff]  ;;  %v28_v30 = vld [vmem:[%s1851_s0 + $0x60] sm:$0xff]  ;;  %v59_v31 = vld [vmem:[%s1851_s0 + $0x158] sm:$0xff] }
  0x1b   :  { %1134 = vmatprep.mubr.msk.f32.mxu0 %vm85_vm0, %v24_v22  ;;  %1182 = vmatprep.mubr.msk.f32.mxu1 %vm85_vm0, %v56_v24  ;;  %v60_v32 = vld [vmem:[%s1851_s0 + $0x160] sm:$0xff]  ;;  %v29_v33 = vld [vmem:[%s1851_s0 + $0x68] sm:$0xff]  ;;  %v30_v34 = vld [vmem:[%s1851_s0 + $0x70] sm:$0xff] }
  0x1c   :  { %v61_v35 = vld [vmem:[%s1851_s0 + $0x168] sm:$0xff]  ;;  %v62_v36 = vld [vmem:[%s1851_s0 + $0x170] sm:$0xff]  ;;  %v31_v37 = vld [vmem:[%s1851_s0 + $0x78] sm:$0xff] }
  0x1d   :  { %v32_v38 = vld [vmem:[%s1851_s0 + $0x80] sm:$0xff]  ;;  %v63_v39 = vld [vmem:[%s1851_s0 + $0x178] sm:$0xff]  ;;  %v33_v41 = vld [vmem:[%s1851_s0 + $0x88] sm:$0xff] }
  0x1e   :  { %1135 = vmatmul.mubr.msk.f32.gmra.mrb[8].mxu0 %vm85_vm0, %v25_v25  ;;  %1183 = vmatmul.mubr.msk.f32.gmra.mrb[8].mxu1 %vm85_vm0, %v57_v27  ;;  %v64_v40 = vld [vmem:[%s1851_s0 + $0x180] sm:$0xff]  ;;  %v34_v42 = vld [vmem:[%s1851_s0 + $0x90] sm:$0xff]  ;;  %v65_v43 = vld [vmem:[%s1851_s0 + $0x188] sm:$0xff] }
  0x1f   :  { %1137 = vmatprep.mubr.msk.f32.mxu0 %vm85_vm0, %v26_v26  ;;  %1185 = vmatprep.mubr.msk.f32.mxu1 %vm85_vm0, %v58_v28  ;;  %v66_v44 = vld [vmem:[%s1851_s0 + $0x190] sm:$0xff]  ;;  %v35_v45 = vld [vmem:[%s1851_s0 + $0x98] sm:$0xff]  ;;  %v36_v46 = vld [vmem:[%s1851_s0 + $0xa0] sm:$0xff] }
  0x20   :  { %v67_v47 = vld [vmem:[%s1851_s0 + $0x198] sm:$0xff]  ;;  %v68_v48 = vld [vmem:[%s1851_s0 + $0x1a0] sm:$0xff]  ;;  %v37_v49 = vld [vmem:[%s1851_s0 + $0xa8] sm:$0xff] }
  0x21   :  { %v38_v50 = vld [vmem:[%s1851_s0 + $0xb0] sm:$0xff]  ;;  %v69_v51 = vld [vmem:[%s1851_s0 + $0x1a8] sm:$0xff]  ;;  %v39_v53 = vld [vmem:[%s1851_s0 + $0xb8] sm:$0xff] }
  0x22   :  { %1138 = vmatmul.mubr.msk.f32.gmra.mrb[10].mxu0 %vm85_vm0, %v27_v29  ;;  %1186 = vmatmul.mubr.msk.f32.gmra.mrb[10].mxu1 %vm85_vm0, %v59_v31  ;;  %v70_v52 = vld [vmem:[%s1851_s0 + $0x1b0] sm:$0xff]  ;;  %v40_v54 = vld [vmem:[%s1851_s0 + $0xc0] sm:$0xff]  ;;  %v71_v55 = vld [vmem:[%s1851_s0 + $0x1b8] sm:$0xff] }
  0x23   :  { %1140 = vmatprep.mubr.msk.f32.mxu0 %vm85_vm0, %v28_v30  ;;  %1188 = vmatprep.mubr.msk.f32.mxu1 %vm85_vm0, %v60_v32  ;;  %v72_v56 = vld [vmem:[%s1851_s0 + $0x1c0] sm:$0xff]  ;;  %v41_v57 = vld [vmem:[%s1851_s0 + $0xc8] sm:$0xff]  ;;  %v42_v58 = vld [vmem:[%s1851_s0 + $0xd0] sm:$0xff] }
  0x24   :  { %v73_v59 = vld [vmem:[%s1851_s0 + $0x1c8] sm:$0xff]  ;;  %v74_v60 = vld [vmem:[%s1851_s0 + $0x1d0] sm:$0xff]  ;;  %v43_v61 = vld [vmem:[%s1851_s0 + $0xd8] sm:$0xff] }
  0x25   :  { %v44_v62 = vld [vmem:[%s1851_s0 + $0xe0] sm:$0xff]  ;;  %v75_v63 = vld [vmem:[%s1851_s0 + $0x1d8] sm:$0xff]  ;;  %v45_v1 = vld [vmem:[%s1851_s0 + $0xe8] sm:$0xff] }
  0x26   :  { %1141 = vmatmul.mubr.msk.f32.gmra.mrb[12].mxu0 %vm85_vm0, %v29_v33  ;;  %1189 = vmatmul.mubr.msk.f32.gmra.mrb[12].mxu1 %vm85_vm0, %v61_v35  ;;  %v76_v0 = vld [vmem:[%s1851_s0 + $0x1e0] sm:$0xff]  ;;  %v46_v2 = vld [vmem:[%s1851_s0 + $0xf0] sm:$0xff]  ;;  %v77_v3 = vld [vmem:[%s1851_s0 + $0x1e8] sm:$0xff] }
  0x27   :  { %1143 = vmatprep.mubr.msk.f32.mxu0 %vm85_vm0, %v30_v34  ;;  %1191 = vmatprep.mubr.msk.f32.mxu1 %vm85_vm0, %v62_v36  ;;  %v78_v4 = vld [vmem:[%s1851_s0 + $0x1f0] sm:$0xff]  ;;  %v47_v5 = vld [vmem:[%s1851_s0 + $0xf8] sm:$0xff] }
  0x28   :  { %v79_v6 = vld [vmem:[%s1851_s0 + $0x1f8] sm:$0xff]  ;;  %s1307_s0 = smov [#allocation2]  }
  0x29   :  { %s940_s18 = sshll.u32 %s1307_s0, 4  ;;  %s1698_s18 = int_to_ptr.vmem [resolvable:$true] %s940_s18 }
  0x2a   :  { %1144 = vmatmul.mubr.msk.f32.gmra.mrb[14].mxu0 %vm85_vm0, %v31_v37  ;;  %1192 = vmatmul.mubr.msk.f32.gmra.mrb[14].mxu1 %vm85_vm0, %v63_v39  ;;  %s1237_s19 = scalar_lea.vmem %s1698_s18, 8192  ;;  %p1242_p1 = scmp.lt.s32.totalorder %s1698_s18, %s1698_s18 }
  0x2b   :  { %1146 = vmatprep.mubr.msk.f32.mxu0 %vm85_vm0, %v32_v38  ;;  %1194 = vmatprep.mubr.msk.f32.mxu1 %vm85_vm0, %v64_v40  ;;  %p1238_p0 = scmp.ne.s32.totalorder %s1698_s18, %s1237_s19  ;;  %p1243_p2 = scmp.lt.s32.totalorder %s1237_s19, %s1237_s19 }
  0x2d   :  { %p1244_p3 = por %p1243_p2, %p1242_p1 }
  0x2e   :  { %1147 = vmatmul.mubr.msk.f32.gmra.mrb[16].mxu0 %vm85_vm0, %v33_v41  ;;  %1195 = vmatmul.mubr.msk.f32.gmra.mrb[16].mxu1 %vm85_vm0, %v65_v43 }
  0x2f   :  { %1149 = vmatprep.mubr.msk.f32.mxu0 %vm85_vm0, %v34_v42  ;;  %1197 = vmatprep.mubr.msk.f32.mxu1 %vm85_vm0, %v66_v44  ;;  %p1245_p4 = pnand %p1244_p3, %p1238_p0 }
  0x32   :  { %1150 = vmatmul.mubr.msk.f32.gmra.mrb[18].mxu0 %vm85_vm0, %v35_v45  ;;  %1198 = vmatmul.mubr.msk.f32.gmra.mrb[18].mxu1 %vm85_vm0, %v67_v47 }
  0x33   :  { %1152 = vmatprep.mubr.msk.f32.mxu0 %vm85_vm0, %v36_v46  ;;  %1200 = vmatprep.mubr.msk.f32.mxu1 %vm85_vm0, %v68_v48 }
  0x36   :  { %1153 = vmatmul.mubr.msk.f32.gmra.mrb[20].mxu0 %vm85_vm0, %v37_v49  ;;  %1201 = vmatmul.mubr.msk.f32.gmra.mrb[20].mxu1 %vm85_vm0, %v69_v51 }
  0x37   :  { %1155 = vmatprep.mubr.msk.f32.mxu0 %vm85_vm0, %v38_v50  ;;  %1203 = vmatprep.mubr.msk.f32.mxu1 %vm85_vm0, %v70_v52 }
  0x3a   :  { %1156 = vmatmul.mubr.msk.f32.gmra.mrb[22].mxu0 %vm85_vm0, %v39_v53  ;;  %1204 = vmatmul.mubr.msk.f32.gmra.mrb[22].mxu1 %vm85_vm0, %v71_v55 }
  0x3b   :  { %1158 = vmatprep.mubr.msk.f32.mxu0 %vm85_vm0, %v40_v54  ;;  %1206 = vmatprep.mubr.msk.f32.mxu1 %vm85_vm0, %v72_v56 }
  0x3e   :  { %1159 = vmatmul.mubr.msk.f32.gmra.mrb[24].mxu0 %vm85_vm0, %v41_v57  ;;  %1207 = vmatmul.mubr.msk.f32.gmra.mrb[24].mxu1 %vm85_vm0, %v73_v59 }
  0x3f   :  { %1161 = vmatprep.mubr.msk.f32.mxu0 %vm85_vm0, %v42_v58  ;;  %1209 = vmatprep.mubr.msk.f32.mxu1 %vm85_vm0, %v74_v60 }
  0x42   :  { %1162 = vmatmul.mubr.msk.f32.gmra.mrb[26].mxu0 %vm85_vm0, %v43_v61  ;;  %1210 = vmatmul.mubr.msk.f32.gmra.mrb[26].mxu1 %vm85_vm0, %v75_v63 }
  0x43   :  { %1164 = vmatprep.mubr.msk.f32.mxu0 %vm85_vm0, %v44_v62  ;;  %1212 = vmatprep.mubr.msk.f32.mxu1 %vm85_vm0, %v76_v0 }
  0x46   :  { %1165 = vmatmul.mubr.msk.f32.gmra.mrb[28].mxu0 %vm85_vm0, %v45_v1  ;;  %1213 = vmatmul.mubr.msk.f32.gmra.mrb[28].mxu1 %vm85_vm0, %v77_v3 }
  0x47   :  { %1167 = vmatprep.mubr.msk.f32.mxu0 %vm85_vm0, %v46_v2  ;;  %1215 = vmatprep.mubr.msk.f32.mxu1 %vm85_vm0, %v78_v4 }
  0x4a   :  { %1168 = vmatmul.mubr.msk.f32.gmra.mrb[30].mxu0 %vm85_vm0, %v47_v5  ;;  %1216 = vmatmul.mubr.msk.f32.gmra.mrb[30].mxu1 %vm85_vm0, %v79_v6 }
  0xe1   :  { %v1124_v7 = vpop.f32.mrb[0].mxu0  ;;  %v1608_v10 = vpop.f32.mrb[0].mxu1 }
  0xe2   :  { %668 = vst [vmem:[#allocation2 + $0x8] sm:$0xff] %v1124_v7  ;;  %v801_v8 = vmul.f32 %v1124_v7, %v1124_v7  ;;  %v348_v9 = vpop.f32.mrb[1].mxu0  ;;  %700 = vst [vmem:[#allocation2 + $0x108] sm:$0xff] %v1608_v10  ;;  %v1611_v13 = vpop.f32.mrb[1].mxu1 }
  0xe3   :  { %667 = vst [vmem:[#allocation2] sm:$0xff] %v348_v9  ;;  %v731_v11 = vadd.f32 %v1124_v7, %v348_v9  ;;  %v800_v12 = vmul.f32 %v348_v9, %v348_v9  ;;  %699 = vst [vmem:[#allocation2 + $0x100] sm:$0xff] %v1611_v13 }
  0xe5   :  { %v864_v14 = vadd.f32 %v801_v8, %v800_v12  ;;  %v1127_v15 = vpop.f32.mrb[2].mxu0  ;;  %v1614_v17 = vpop.f32.mrb[2].mxu1 }
  0xe6   :  { %670 = vst [vmem:[#allocation2 + $0x18] sm:$0xff] %v1127_v15  ;;  %v358_v16 = vpop.f32.mrb[3].mxu0  ;;  %702 = vst [vmem:[#allocation2 + $0x118] sm:$0xff] %v1614_v17  ;;  %v1617_v20 = vpop.f32.mrb[3].mxu1  ;;  %v803_v21 = vmul.f32 %v1127_v15, %v1127_v15 }
  0xe7   :  { %669 = vst [vmem:[#allocation2 + $0x10] sm:$0xff] %v358_v16  ;;  %v732_v18 = vadd.f32 %v731_v11, %v358_v16  ;;  %v802_v19 = vmul.f32 %v358_v16, %v358_v16  ;;  %701 = vst [vmem:[#allocation2 + $0x110] sm:$0xff] %v1617_v20 }
  0xe9   :  { %v865_v22 = vadd.f32 %v864_v14, %v802_v19  ;;  %v1130_v23 = vpop.f32.mrb[4].mxu0  ;;  %v733_v24 = vadd.f32 %v1127_v15, %v732_v18  ;;  %v1620_v26 = vpop.f32.mrb[4].mxu1 }
  0xea   :  { %672 = vst [vmem:[#allocation2 + $0x28] sm:$0xff] %v1130_v23  ;;  %v368_v25 = vpop.f32.mrb[5].mxu0  ;;  %704 = vst [vmem:[#allocation2 + $0x128] sm:$0xff] %v1620_v26  ;;  %v1623_v30 = vpop.f32.mrb[5].mxu1  ;;  %v805_v31 = vmul.f32 %v1130_v23, %v1130_v23 }
  0xeb   :  { %671 = vst [vmem:[#allocation2 + $0x20] sm:$0xff] %v368_v25  ;;  %v734_v27 = vadd.f32 %v733_v24, %v368_v25  ;;  %v804_v28 = vmul.f32 %v368_v25, %v368_v25  ;;  %v866_v29 = vadd.f32 %v865_v22, %v803_v21  ;;  %703 = vst [vmem:[#allocation2 + $0x120] sm:$0xff] %v1623_v30 }
  0xed   :  { %v867_v32 = vadd.f32 %v866_v29, %v804_v28  ;;  %v1133_v33 = vpop.f32.mrb[6].mxu0  ;;  %v735_v34 = vadd.f32 %v1130_v23, %v734_v27  ;;  %v1626_v36 = vpop.f32.mrb[6].mxu1 }
  0xee   :  { %674 = vst [vmem:[#allocation2 + $0x38] sm:$0xff] %v1133_v33  ;;  %v378_v35 = vpop.f32.mrb[7].mxu0  ;;  %706 = vst [vmem:[#allocation2 + $0x138] sm:$0xff] %v1626_v36  ;;  %v1629_v40 = vpop.f32.mrb[7].mxu1  ;;  %v807_v41 = vmul.f32 %v1133_v33, %v1133_v33 }
  0xef   :  { %673 = vst [vmem:[#allocation2 + $0x30] sm:$0xff] %v378_v35  ;;  %v736_v37 = vadd.f32 %v735_v34, %v378_v35  ;;  %v806_v38 = vmul.f32 %v378_v35, %v378_v35  ;;  %v868_v39 = vadd.f32 %v867_v32, %v805_v31  ;;  %705 = vst [vmem:[#allocation2 + $0x130] sm:$0xff] %v1629_v40 }
  0xf1   :  { %v869_v42 = vadd.f32 %v868_v39, %v806_v38  ;;  %v1136_v43 = vpop.f32.mrb[8].mxu0  ;;  %v737_v44 = vadd.f32 %v1133_v33, %v736_v37  ;;  %v1632_v46 = vpop.f32.mrb[8].mxu1 }
  0xf2   :  { %676 = vst [vmem:[#allocation2 + $0x48] sm:$0xff] %v1136_v43  ;;  %v388_v45 = vpop.f32.mrb[9].mxu0  ;;  %708 = vst [vmem:[#allocation2 + $0x148] sm:$0xff] %v1632_v46  ;;  %v1635_v50 = vpop.f32.mrb[9].mxu1  ;;  %v809_v51 = vmul.f32 %v1136_v43, %v1136_v43 }
  0xf3   :  { %675 = vst [vmem:[#allocation2 + $0x40] sm:$0xff] %v388_v45  ;;  %v738_v47 = vadd.f32 %v737_v44, %v388_v45  ;;  %v808_v48 = vmul.f32 %v388_v45, %v388_v45  ;;  %v870_v49 = vadd.f32 %v869_v42, %v807_v41  ;;  %707 = vst [vmem:[#allocation2 + $0x140] sm:$0xff] %v1635_v50 }
  0xf5   :  { %v871_v52 = vadd.f32 %v870_v49, %v808_v48  ;;  %v1139_v53 = vpop.f32.mrb[10].mxu0  ;;  %v739_v54 = vadd.f32 %v1136_v43, %v738_v47  ;;  %v1638_v56 = vpop.f32.mrb[10].mxu1 }
  0xf6   :  { %678 = vst [vmem:[#allocation2 + $0x58] sm:$0xff] %v1139_v53  ;;  %v398_v55 = vpop.f32.mrb[11].mxu0  ;;  %710 = vst [vmem:[#allocation2 + $0x158] sm:$0xff] %v1638_v56  ;;  %v1641_v60 = vpop.f32.mrb[11].mxu1  ;;  %v811_v61 = vmul.f32 %v1139_v53, %v1139_v53 }
  0xf7   :  { %677 = vst [vmem:[#allocation2 + $0x50] sm:$0xff] %v398_v55  ;;  %v740_v57 = vadd.f32 %v739_v54, %v398_v55  ;;  %v810_v58 = vmul.f32 %v398_v55, %v398_v55  ;;  %v872_v59 = vadd.f32 %v871_v52, %v809_v51  ;;  %709 = vst [vmem:[#allocation2 + $0x150] sm:$0xff] %v1641_v60 }
  0xf9   :  { %v873_v62 = vadd.f32 %v872_v59, %v810_v58  ;;  %v1142_v63 = vpop.f32.mrb[12].mxu0  ;;  %v741_v0 = vadd.f32 %v1139_v53, %v740_v57  ;;  %v1644_v2 = vpop.f32.mrb[12].mxu1 }
  0xfa   :  { %680 = vst [vmem:[#allocation2 + $0x68] sm:$0xff] %v1142_v63  ;;  %v408_v1 = vpop.f32.mrb[13].mxu0  ;;  %712 = vst [vmem:[#allocation2 + $0x168] sm:$0xff] %v1644_v2  ;;  %v1647_v6 = vpop.f32.mrb[13].mxu1  ;;  %v813_v7 = vmul.f32 %v1142_v63, %v1142_v63 }
  0xfb   :  { %679 = vst [vmem:[#allocation2 + $0x60] sm:$0xff] %v408_v1  ;;  %v742_v3 = vadd.f32 %v741_v0, %v408_v1  ;;  %v812_v4 = vmul.f32 %v408_v1, %v408_v1  ;;  %v874_v5 = vadd.f32 %v873_v62, %v811_v61  ;;  %711 = vst [vmem:[#allocation2 + $0x160] sm:$0xff] %v1647_v6 }
  0xfd   :  { %v875_v8 = vadd.f32 %v874_v5, %v812_v4  ;;  %v1145_v9 = vpop.f32.mrb[14].mxu0  ;;  %v743_v11 = vadd.f32 %v1142_v63, %v742_v3  ;;  %v1650_v14 = vpop.f32.mrb[14].mxu1 }
  0xfe   :  { %682 = vst [vmem:[#allocation2 + $0x78] sm:$0xff] %v1145_v9  ;;  %v418_v12 = vpop.f32.mrb[15].mxu0  ;;  %714 = vst [vmem:[#allocation2 + $0x178] sm:$0xff] %v1650_v14  ;;  %v1653_v19 = vpop.f32.mrb[15].mxu1  ;;  %v815_v21 = vmul.f32 %v1145_v9, %v1145_v9 }
  0xff   :  { %681 = vst [vmem:[#allocation2 + $0x70] sm:$0xff] %v418_v12  ;;  %v744_v15 = vadd.f32 %v743_v11, %v418_v12  ;;  %v814_v16 = vmul.f32 %v418_v12, %v418_v12  ;;  %v876_v18 = vadd.f32 %v875_v8, %v813_v7  ;;  %713 = vst [vmem:[#allocation2 + $0x170] sm:$0xff] %v1653_v19 }
 0x101   :  { %v877_v22 = vadd.f32 %v876_v18, %v814_v16  ;;  %v1148_v23 = vpop.f32.mrb[16].mxu0  ;;  %v745_v24 = vadd.f32 %v1145_v9, %v744_v15  ;;  %v1656_v27 = vpop.f32.mrb[16].mxu1 }
 0x102   :  { %684 = vst [vmem:[#allocation2 + $0x88] sm:$0xff] %v1148_v23  ;;  %v428_v25 = vpop.f32.mrb[17].mxu0  ;;  %716 = vst [vmem:[#allocation2 + $0x188] sm:$0xff] %v1656_v27  ;;  %v1659_v32 = vpop.f32.mrb[17].mxu1  ;;  %v817_v33 = vmul.f32 %v1148_v23, %v1148_v23 }
 0x103   :  { %683 = vst [vmem:[#allocation2 + $0x80] sm:$0xff] %v428_v25  ;;  %v746_v28 = vadd.f32 %v745_v24, %v428_v25  ;;  %v816_v29 = vmul.f32 %v428_v25, %v428_v25  ;;  %v878_v31 = vadd.f32 %v877_v22, %v815_v21  ;;  %715 = vst [vmem:[#allocation2 + $0x180] sm:$0xff] %v1659_v32 }
 0x105   :  { %v879_v34 = vadd.f32 %v878_v31, %v816_v29  ;;  %v1151_v35 = vpop.f32.mrb[18].mxu0  ;;  %v747_v37 = vadd.f32 %v1148_v23, %v746_v28  ;;  %v1662_v39 = vpop.f32.mrb[18].mxu1 }
 0x106   :  { %686 = vst [vmem:[#allocation2 + $0x98] sm:$0xff] %v1151_v35  ;;  %v438_v38 = vpop.f32.mrb[19].mxu0  ;;  %718 = vst [vmem:[#allocation2 + $0x198] sm:$0xff] %v1662_v39  ;;  %v1665_v44 = vpop.f32.mrb[19].mxu1  ;;  %v819_v45 = vmul.f32 %v1151_v35, %v1151_v35 }
 0x107   :  { %685 = vst [vmem:[#allocation2 + $0x90] sm:$0xff] %v438_v38  ;;  %v748_v41 = vadd.f32 %v747_v37, %v438_v38  ;;  %v818_v42 = vmul.f32 %v438_v38, %v438_v38  ;;  %v880_v43 = vadd.f32 %v879_v34, %v817_v33  ;;  %717 = vst [vmem:[#allocation2 + $0x190] sm:$0xff] %v1665_v44 }
 0x109   :  { %v881_v47 = vadd.f32 %v880_v43, %v818_v42  ;;  %v1154_v48 = vpop.f32.mrb[20].mxu0  ;;  %v749_v49 = vadd.f32 %v1151_v35, %v748_v41  ;;  %v1668_v52 = vpop.f32.mrb[20].mxu1 }
 0x10a   :  { %688 = vst [vmem:[#allocation2 + $0xa8] sm:$0xff] %v1154_v48  ;;  %v448_v51 = vpop.f32.mrb[21].mxu0  ;;  %720 = vst [vmem:[#allocation2 + $0x1a8] sm:$0xff] %v1668_v52  ;;  %v1671_v57 = vpop.f32.mrb[21].mxu1  ;;  %v821_v58 = vmul.f32 %v1154_v48, %v1154_v48 }
 0x10b   :  { %687 = vst [vmem:[#allocation2 + $0xa0] sm:$0xff] %v448_v51  ;;  %v750_v53 = vadd.f32 %v749_v49, %v448_v51  ;;  %v820_v54 = vmul.f32 %v448_v51, %v448_v51  ;;  %v882_v55 = vadd.f32 %v881_v47, %v819_v45  ;;  %719 = vst [vmem:[#allocation2 + $0x1a0] sm:$0xff] %v1671_v57 }
 0x10d   :  { %v883_v59 = vadd.f32 %v882_v55, %v820_v54  ;;  %v1157_v61 = vpop.f32.mrb[22].mxu0  ;;  %v751_v62 = vadd.f32 %v1154_v48, %v750_v53  ;;  %v1674_v0 = vpop.f32.mrb[22].mxu1 }
 0x10e   :  { %690 = vst [vmem:[#allocation2 + $0xb8] sm:$0xff] %v1157_v61  ;;  %v458_v63 = vpop.f32.mrb[23].mxu0  ;;  %722 = vst [vmem:[#allocation2 + $0x1b8] sm:$0xff] %v1674_v0  ;;  %v1677_v5 = vpop.f32.mrb[23].mxu1  ;;  %v823_v7 = vmul.f32 %v1157_v61, %v1157_v61 }
 0x10f   :  { %689 = vst [vmem:[#allocation2 + $0xb0] sm:$0xff] %v458_v63  ;;  %v752_v1 = vadd.f32 %v751_v62, %v458_v63  ;;  %v822_v3 = vmul.f32 %v458_v63, %v458_v63  ;;  %v884_v4 = vadd.f32 %v883_v59, %v821_v58  ;;  %721 = vst [vmem:[#allocation2 + $0x1b0] sm:$0xff] %v1677_v5 }
 0x111   :  { %v885_v8 = vadd.f32 %v884_v4, %v822_v3  ;;  %v1160_v9 = vpop.f32.mrb[24].mxu0  ;;  %v753_v11 = vadd.f32 %v1157_v61, %v752_v1  ;;  %v1680_v15 = vpop.f32.mrb[24].mxu1 }
 0x112   :  { %692 = vst [vmem:[#allocation2 + $0xc8] sm:$0xff] %v1160_v9  ;;  %v468_v12 = vpop.f32.mrb[25].mxu0  ;;  %724 = vst [vmem:[#allocation2 + $0x1c8] sm:$0xff] %v1680_v15  ;;  %v1683_v22 = vpop.f32.mrb[25].mxu1  ;;  %v825_v23 = vmul.f32 %v1160_v9, %v1160_v9 }
 0x113   :  { %691 = vst [vmem:[#allocation2 + $0xc0] sm:$0xff] %v468_v12  ;;  %v754_v16 = vadd.f32 %v753_v11, %v468_v12  ;;  %v824_v18 = vmul.f32 %v468_v12, %v468_v12  ;;  %v886_v21 = vadd.f32 %v885_v8, %v823_v7  ;;  %723 = vst [vmem:[#allocation2 + $0x1c0] sm:$0xff] %v1683_v22 }
 0x114   :  { %v832_v11 = vmul.f32 %v1611_v13, %v1611_v13 }
 0x115   :  { %v887_v24 = vadd.f32 %v886_v21, %v824_v18  ;;  %v1163_v25 = vpop.f32.mrb[26].mxu0  ;;  %v755_v28 = vadd.f32 %v1160_v9, %v754_v16  ;;  %v1686_v31 = vpop.f32.mrb[26].mxu1 }
 0x116   :  { %694 = vst [vmem:[#allocation2 + $0xd8] sm:$0xff] %v1163_v25  ;;  %v478_v29 = vpop.f32.mrb[27].mxu0  ;;  %726 = vst [vmem:[#allocation2 + $0x1d8] sm:$0xff] %v1686_v31  ;;  %v1689_v37 = vpop.f32.mrb[27].mxu1  ;;  %v827_v38 = vmul.f32 %v1163_v25, %v1163_v25 }
 0x117   :  { %693 = vst [vmem:[#allocation2 + $0xd0] sm:$0xff] %v478_v29  ;;  %v756_v33 = vadd.f32 %v755_v28, %v478_v29  ;;  %v826_v34 = vmul.f32 %v478_v29, %v478_v29  ;;  %v888_v35 = vadd.f32 %v887_v24, %v825_v23  ;;  %725 = vst [vmem:[#allocation2 + $0x1d0] sm:$0xff] %v1689_v37 }
 0x119   :  { %v889_v41 = vadd.f32 %v888_v35, %v826_v34  ;;  %v1166_v42 = vpop.f32.mrb[28].mxu0  ;;  %v757_v43 = vadd.f32 %v1163_v25, %v756_v33  ;;  %v1692_v47 = vpop.f32.mrb[28].mxu1 }
 0x11a   :  { %696 = vst [vmem:[#allocation2 + $0xe8] sm:$0xff] %v1166_v42  ;;  %v488_v45 = vpop.f32.mrb[29].mxu0  ;;  %728 = vst [vmem:[#allocation2 + $0x1e8] sm:$0xff] %v1692_v47  ;;  %v1695_v53 = vpop.f32.mrb[29].mxu1  ;;  %v829_v54 = vmul.f32 %v1166_v42, %v1166_v42 }
 0x11b   :  { %695 = vst [vmem:[#allocation2 + $0xe0] sm:$0xff] %v488_v45  ;;  %v758_v48 = vadd.f32 %v757_v43, %v488_v45  ;;  %v828_v49 = vmul.f32 %v488_v45, %v488_v45  ;;  %v890_v51 = vadd.f32 %v889_v41, %v827_v38  ;;  %727 = vst [vmem:[#allocation2 + $0x1e0] sm:$0xff] %v1695_v53 }
 0x11d   :  { %v891_v55 = vadd.f32 %v890_v51, %v828_v49  ;;  %v1169_v58 = vpop.f32.mrb[30].mxu0  ;;  %v759_v59 = vadd.f32 %v1166_v42, %v758_v48  ;;  %v1700_v62 = vpop.f32.mrb[30].mxu1 }
 0x11e   :  { %698 = vst [vmem:[#allocation2 + $0xf8] sm:$0xff] %v1169_v58  ;;  %v498_v61 = vpop.f32.mrb[31].mxu0  ;;  %730 = vst [vmem:[#allocation2 + $0x1f8] sm:$0xff] %v1700_v62  ;;  %v1703_v4 = vpop.f32.mrb[31].mxu1  ;;  %v831_v7 = vmul.f32 %v1169_v58, %v1169_v58 }
 0x11f   :  { %697 = vst [vmem:[#allocation2 + $0xf0] sm:$0xff] %v498_v61  ;;  %v760_v63 = vadd.f32 %v759_v59, %v498_v61  ;;  %v830_v1 = vmul.f32 %v498_v61, %v498_v61  ;;  %v892_v3 = vadd.f32 %v891_v55, %v829_v54  ;;  %729 = vst [vmem:[#allocation2 + $0x1f0] sm:$0xff] %v1703_v4 }
 0x121   :  { %v761_v8 = vadd.f32 %v1169_v58, %v760_v63  ;;  %v893_v9 = vadd.f32 %v892_v3, %v830_v1 }
 0x122   :  { %1248 = shalt.err (!%p1245_p4)
}
 0x123   :  { %s1249_s22 = scalar_lea.hbm %s1853_s2, 8192 }
 0x124   :  { %p1250_p5 = scmp.ne.s32.totalorder %s1853_s2, %s1249_s22  ;;  %p1253_p6 = scmp.lt.u32.totalorder %s1249_s22, %s1853_s2 }
 0x126   :  { %p1255_p7 = pnand %p1253_p6, %p1250_p5 }
 0x128   :  { %1258 = shalt.err (!%p1255_p7)
}
 0x129   :  { %s1308_s27 = smov 128   ;;  %s1309_s28 = smov 8   ;;  %v894_v12 = vadd.f32 %v893_v9, %v831_v7  ;;  %v762_v16 = vadd.f32 %v761_v8, %v1611_v13  ;;  %v833_v18 = vmul.f32 %v1608_v10, %v1608_v10  ;;  %v834_v24 = vmul.f32 %v1617_v20, %v1617_v20 }
 0x12a   :  { %946 = dma.vmem_to_hbm [thread:$0]  %s1698_s18, 8192, %s1853_s2, [#allocation3], %s1308_s27, %s1308_s27, %s1309_s28   ;;  %v835_v29 = vmul.f32 %v1614_v17, %v1614_v17  ;;  %v836_v13 = vmul.f32 %v1623_v30, %v1623_v30 }
 0x12b   :  { %v895_v21 = vadd.f32 %v894_v12, %v832_v11  ;;  %v763_v23 = vadd.f32 %v1608_v10, %v762_v16  ;;  %v837_v10 = vmul.f32 %v1620_v26, %v1620_v26  ;;  %s1310_s2 = smov [#allocation4]   ;;  %s1311_s6 = smov [#allocation6]  }
 0x12c   :  { %s953_s5 = sshll.u32 %s1310_s2, 4  ;;  %s963_s1 = sshll.u32 %s1311_s6, 4  ;;  %s954_s5 = int_to_ptr.vmem [resolvable:$true] %s953_s5  ;;  %s1819_s1 = int_to_ptr.vmem [resolvable:$true] %s963_s1 }
 0x12d   :  { %v764_v25 = vadd.f32 %v763_v23, %v1617_v20  ;;  %v896_v28 = vadd.f32 %v895_v21, %v833_v18  ;;  %v838_v20 = vmul.f32 %v1629_v40, %v1629_v40  ;;  %s1259_s7 = scalar_lea.vmem %s954_s5, 16  ;;  %s1263_s8 = scalar_lea.vmem %s954_s5, 32 }
 0x12e   :  { %p1260_p8 = scmp.ne.s32.totalorder %s954_s5, %s1259_s7  ;;  %p1264_p9 = scmp.lt.s32.totalorder %s954_s5, %s954_s5 }
 0x12f   :  { %v897_v33 = vadd.f32 %v896_v28, %v834_v24  ;;  %v765_v34 = vadd.f32 %v1614_v17, %v764_v25  ;;  %v839_v17 = vmul.f32 %v1626_v36, %v1626_v36  ;;  %p1265_p10 = scmp.lt.s32.totalorder %s1263_s8, %s1259_s7 }
 0x131   :  { %v766_v35 = vadd.f32 %v765_v34, %v1623_v30  ;;  %v898_v38 = vadd.f32 %v897_v33, %v835_v29  ;;  %v840_v30 = vmul.f32 %v1635_v50, %v1635_v50  ;;  %p1266_p11 = por %p1265_p10, %p1264_p9 }
 0x133   :  { %v899_v41 = vadd.f32 %v898_v38, %v836_v13  ;;  %v767_v42 = vadd.f32 %v1620_v26, %v766_v35  ;;  %v841_v26 = vmul.f32 %v1632_v46, %v1632_v46  ;;  %p1267_p12 = pnand %p1266_p11, %p1260_p8 }
 0x135   :  { %v768_v43 = vadd.f32 %v767_v42, %v1629_v40  ;;  %v900_v45 = vadd.f32 %v899_v41, %v837_v10  ;;  %v842_v40 = vmul.f32 %v1641_v60, %v1641_v60 }
 0x137   :  { %v901_v48 = vadd.f32 %v900_v45, %v838_v20  ;;  %v769_v49 = vadd.f32 %v1626_v36, %v768_v43  ;;  %v843_v36 = vmul.f32 %v1638_v56, %v1638_v56 }
 0x139   :  { %v770_v51 = vadd.f32 %v769_v49, %v1635_v50  ;;  %v902_v54 = vadd.f32 %v901_v48, %v839_v17  ;;  %v844_v50 = vmul.f32 %v1647_v6, %v1647_v6 }
 0x13b   :  { %v903_v55 = vadd.f32 %v902_v54, %v840_v30  ;;  %v771_v58 = vadd.f32 %v1632_v46, %v770_v51  ;;  %v845_v46 = vmul.f32 %v1644_v2, %v1644_v2 }
 0x13d   :  { %v772_v59 = vadd.f32 %v771_v58, %v1641_v60  ;;  %v904_v61 = vadd.f32 %v903_v55, %v841_v26  ;;  %v846_v60 = vmul.f32 %v1653_v19, %v1653_v19 }
 0x13f   :  { %v905_v63 = vadd.f32 %v904_v61, %v842_v40  ;;  %v773_v1 = vadd.f32 %v1638_v56, %v772_v59  ;;  %v847_v56 = vmul.f32 %v1650_v14, %v1650_v14 }
 0x141   :  { %v774_v3 = vadd.f32 %v773_v1, %v1647_v6  ;;  %v906_v7 = vadd.f32 %v905_v63, %v843_v36  ;;  %v848_v6 = vmul.f32 %v1659_v32, %v1659_v32 }
 0x143   :  { %v907_v8 = vadd.f32 %v906_v7, %v844_v50  ;;  %v775_v9 = vadd.f32 %v1644_v2, %v774_v3  ;;  %v849_v2 = vmul.f32 %v1656_v27, %v1656_v27 }
 0x145   :  { %v776_v11 = vadd.f32 %v775_v9, %v1653_v19  ;;  %v908_v12 = vadd.f32 %v907_v8, %v845_v46  ;;  %v850_v19 = vmul.f32 %v1665_v44, %v1665_v44 }
 0x147   :  { %v909_v16 = vadd.f32 %v908_v12, %v846_v60  ;;  %v777_v18 = vadd.f32 %v1650_v14, %v776_v11  ;;  %v851_v14 = vmul.f32 %v1662_v39, %v1662_v39 }
 0x149   :  { %v778_v21 = vadd.f32 %v777_v18, %v1659_v32  ;;  %v910_v23 = vadd.f32 %v909_v16, %v847_v56  ;;  %v852_v32 = vmul.f32 %v1671_v57, %v1671_v57 }
 0x14b   :  { %v911_v24 = vadd.f32 %v910_v23, %v848_v6  ;;  %v779_v25 = vadd.f32 %v1656_v27, %v778_v21  ;;  %v853_v27 = vmul.f32 %v1668_v52, %v1668_v52 }
 0x14d   :  { %v780_v28 = vadd.f32 %v779_v25, %v1665_v44  ;;  %v912_v29 = vadd.f32 %v911_v24, %v849_v2  ;;  %v854_v44 = vmul.f32 %v1677_v5, %v1677_v5 }
 0x14f   :  { %v913_v33 = vadd.f32 %v912_v29, %v850_v19  ;;  %v781_v34 = vadd.f32 %v1662_v39, %v780_v28  ;;  %v855_v39 = vmul.f32 %v1674_v0, %v1674_v0 }
 0x151   :  { %v782_v13 = vadd.f32 %v781_v34, %v1671_v57  ;;  %v914_v35 = vadd.f32 %v913_v33, %v851_v14  ;;  %v856_v57 = vmul.f32 %v1683_v22, %v1683_v22 }
 0x153   :  { %v915_v38 = vadd.f32 %v914_v35, %v852_v32  ;;  %v783_v10 = vadd.f32 %v1668_v52, %v782_v13  ;;  %v857_v52 = vmul.f32 %v1680_v15, %v1680_v15 }
 0x155   :  { %v784_v41 = vadd.f32 %v783_v10, %v1677_v5  ;;  %v916_v42 = vadd.f32 %v915_v38, %v853_v27  ;;  %v858_v5 = vmul.f32 %v1689_v37, %v1689_v37 }
 0x157   :  { %v917_v20 = vadd.f32 %v916_v42, %v854_v44  ;;  %v785_v43 = vadd.f32 %v1674_v0, %v784_v41  ;;  %v859_v0 = vmul.f32 %v1686_v31, %v1686_v31 }
 0x159   :  { %v786_v45 = vadd.f32 %v785_v43, %v1683_v22  ;;  %v918_v17 = vadd.f32 %v917_v20, %v855_v39  ;;  %v860_v22 = vmul.f32 %v1695_v53, %v1695_v53 }
 0x15b   :  { %v919_v48 = vadd.f32 %v918_v17, %v856_v57  ;;  %v787_v49 = vadd.f32 %v1680_v15, %v786_v45  ;;  %v861_v15 = vmul.f32 %v1692_v47, %v1692_v47 }
 0x15d   :  { %v788_v30 = vadd.f32 %v787_v49, %v1689_v37  ;;  %v920_v51 = vadd.f32 %v919_v48, %v857_v52  ;;  %v862_v37 = vmul.f32 %v1703_v4, %v1703_v4 }
 0x15f   :  { %v921_v54 = vadd.f32 %v920_v51, %v858_v5  ;;  %v789_v26 = vadd.f32 %v1686_v31, %v788_v30  ;;  %v863_v31 = vmul.f32 %v1700_v62, %v1700_v62 }
 0x161   :  { %v790_v55 = vadd.f32 %v789_v26, %v1695_v53  ;;  %v922_v58 = vadd.f32 %v921_v54, %v859_v0 }
 0x163   :  { %v923_v40 = vadd.f32 %v922_v58, %v860_v22  ;;  %v791_v59 = vadd.f32 %v1692_v47, %v790_v55 }
 0x165   :  { %v792_v61 = vadd.f32 %v791_v59, %v1703_v4  ;;  %v924_v36 = vadd.f32 %v923_v40, %v861_v15 }
 0x167   :  { %v793_v63 = vadd.f32 %v1700_v62, %v792_v61  ;;  %v925_v1 = vadd.f32 %v924_v36, %v862_v37 }
 0x169   :  { %v794_v53 = vrot.slane %v793_v63, 4  ;;  %v926_v50 = vadd.f32 %v925_v1, %v863_v31 }
 0x16b   :  { %v795_v3 = vadd.f32 %v794_v53, %v793_v63  ;;  %v927_v7 = vrot.slane %v926_v50, 4 }
 0x16d   :  { %v796_v46 = vrot.slane %v795_v3, 2  ;;  %v928_v8 = vadd.f32 %v927_v7, %v926_v50 }
 0x16f   :  { %v797_v9 = vadd.f32 %v796_v46, %v795_v3  ;;  %v929_v47 = vrot.slane %v928_v8, 2 }
 0x171   :  { %v798_v60 = vrot.slane %v797_v9, 1  ;;  %v930_v11 = vadd.f32 %v929_v47, %v928_v8 }
 0x173   :  { %v799_v4 = vadd.f32 %v798_v60, %v797_v9  ;;  %v931_v12 = vrot.slane %v930_v11, 1 }
 0x175   :  { %933 = vst [vmem:[#allocation4] sm:$0x1] %v799_v4  ;;  %v932_v62 = vadd.f32 %v931_v12, %v930_v11 }
 0x176   :  { %1270 = shalt.err (!%p1267_p12)
}
 0x177   :  { %s1271_s11 = scalar_lea.hbm %s1854_s3, 16 }
 0x178   :  { %p1272_p13 = scmp.ne.s32.totalorder %s1854_s3, %s1271_s11  ;;  %p1275_p0 = scmp.lt.u32.totalorder %s1271_s11, %s1854_s3 }
 0x17a   :  { %p1277_p1 = pnand %p1275_p0, %p1272_p13 }
 0x17c   :  { %1280 = shalt.err (!%p1277_p1)
}
 0x17d   :  { %956 = dma.vmem_to_hbm [thread:$0]  %s954_s5, 16, %s1854_s3, [#allocation5]   ;;  %934 = vst [vmem:[#allocation6] sm:$0x1] %v932_v62 }
 0x17e   :  { %s1281_s0 = scalar_lea.vmem %s1819_s1, 16  ;;  %s1285_s18 = scalar_lea.vmem %s1819_s1, 32 }
 0x17f   :  { %p1282_p2 = scmp.ne.s32.totalorder %s1819_s1, %s1281_s0  ;;  %p1286_p3 = scmp.lt.s32.totalorder %s1819_s1, %s1819_s1 }
 0x180   :  { %p1287_p4 = scmp.lt.s32.totalorder %s1285_s18, %s1281_s0 }
 0x182   :  { %p1288_p5 = por %p1287_p4, %p1286_p3 }
 0x184   :  { %p1289_p6 = pnand %p1288_p5, %p1282_p2 }
 0x186   :  { %1292 = shalt.err (!%p1289_p6)
}
 0x187   :  { %s1293_s21 = scalar_lea.hbm %s1855_s4, 16 }
 0x188   :  { %p1294_p7 = scmp.ne.s32.totalorder %s1855_s4, %s1293_s21  ;;  %p1297_p8 = scmp.lt.u32.totalorder %s1293_s21, %s1855_s4 }
 0x18a   :  { %p1299_p9 = pnand %p1297_p8, %p1294_p7 }
 0x18c   :  { %1302 = shalt.err (!%p1299_p9)
}
 0x18d   :  { %966 = dma.vmem_to_hbm [thread:$0]  %s1819_s1, 16, %s1855_s4, [#allocation5]  }
 0x18e   :  { %1303 = dma.done.wait [#allocation3], 8192  }
 0x18f   :  { %1304 = vsyncadd [#allocation3], 4294959104 }
 0x190   :  { %1305 = dma.done.wait [#allocation5], 32  }
 0x191   :  { %1306 = vsyncadd [#allocation5], 4294967264 }
 0x192   :  { %976 = vsyncpa [#allocation3], 1 }
 0x193   :  { %977 = vsyncpa [#allocation5], 1 }

</bundles_post_ra>
